<compile_context>
chip_gen: v7x
topology: tpu7x:2x2x1
jax: 0.10.0
libtpu: 0.0.40
codegen_flags: <defaults>
</compile_context>

<pallas_src>
import functools
import math

import jax
import jax.numpy as jnp
from jax import lax
from jax.experimental import pallas as pl
from jax.experimental.pallas import tpu as pltpu


def _layer_norm(x, gamma, beta, eps=1e-12):
    u = jnp.mean(x, axis=-1, keepdims=True)
    d = x - u
    s = jnp.mean(d * d, axis=-1, keepdims=True)
    return gamma * (d * lax.rsqrt(s + eps)) + beta


def encoder_layer_kernel(x_ref, mask_ref,
                         wqkv_ref, bqkv_ref, wo3_ref, bo_ref,
                         g1_ref, be1_ref,
                         w1_ref, b1_ref, w2_ref, b2_ref,
                         g2_ref, be2_ref,
                         out_ref, *, num_heads):
    # One batch element per grid step; everything lives in VMEM.
    x = x_ref[0]              # [S, E]
    mask = mask_ref[0, 0]     # [1, S] additive mask (broadcasts over heads & query rows)

    # --- fused Q/K/V projection: one MXU op with N = 3*H ----------------------
    # 1/sqrt(dh) is already folded into the Q columns of wqkv / bqkv.
    qkv = jnp.dot(x, wqkv_ref[...], preferred_element_type=jnp.float32) + bqkv_ref[...]
    H = qkv.shape[-1] // 3
    dh = H // num_heads

    # --- head-batched attention ------------------------------------------------
    # Stack along the leading (untiled) axis -> [NH, S, dh].
    q3 = jnp.stack([qkv[:, h * dh:(h + 1) * dh] for h in range(num_heads)], axis=0)
    k3 = jnp.stack([qkv[:, H + h * dh:H + (h + 1) * dh] for h in range(num_heads)], axis=0)
    v3 = jnp.stack([qkv[:, 2 * H + h * dh:2 * H + (h + 1) * dh] for h in range(num_heads)], axis=0)

    scores = jnp.einsum('hqd,hkd->hqk', q3, k3,
                        preferred_element_type=jnp.float32)          # [NH, S, S]
    scores = scores + mask                                           # + [1, S] (key axis)
    m = jnp.max(scores, axis=-1, keepdims=True)
    p = jnp.exp(scores - m)
    p = p * pl.reciprocal(jnp.sum(p, axis=-1, keepdims=True), approx=True)
    ctx3 = jnp.einsum('hqk,hkd->hqd', p, v3,
                      preferred_element_type=jnp.float32)            # [NH, S, dh]

    # Output projection without a lane-axis head concat:
    # per-head [S, dh] @ [dh, E] (batched over heads) then sum over heads.
    dense3 = jnp.einsum('hqd,hde->hqe', ctx3, wo3_ref[...],
                        preferred_element_type=jnp.float32)          # [NH, S, E]
    dense = jnp.sum(dense3, axis=0) + bo_ref[...]                    # [S, E]

    # --- add & norm (dropout = identity in eval) -------------------------------
    attn_out = _layer_norm(dense + x, g1_ref[...], be1_ref[...])

    # --- FFN + add & norm -------------------------------------------------------
    h1 = jnp.dot(attn_out, w1_ref[...], preferred_element_type=jnp.float32) + b1_ref[...]
    h1 = jnp.maximum(h1, 0.0)                                        # ReLU
    h2 = jnp.dot(h1, w2_ref[...], preferred_element_type=jnp.float32) + b2_ref[...]
    out = _layer_norm(h2 + attn_out, g2_ref[...], be2_ref[...])

    out_ref[0] = out.astype(out_ref.dtype)


def encoder_layer(x, mask, params, *, num_heads):
    (wq, bq, wk, bk, wv, bv, wo, bo, g1, be1, w1, bb1, w2, bb2, g2, be2) = params
    B, S, E = x.shape
    H = wq.shape[1]
    dh = H // num_heads
    scale = jnp.float32(1.0 / math.sqrt(dh))

    # Wrapper-side (free) param packing for the fused / head-batched kernel.
    #   * scale folded into the Q projection so the kernel does no extra mul.
    #   * output-projection weight reshaped per-head -> [NH, dh, E].
    wqkv = jnp.concatenate([wq * scale, wk, wv], axis=1)   # [E, 3H]
    bqkv = jnp.concatenate([bq * scale, bk, bv], axis=1)   # [1, 3H]
    wo3 = wo.reshape(num_heads, dh, E)                     # [NH, dh, E]

    packed = (wqkv, bqkv, wo3, bo, g1, be1, w1, bb1, w2, bb2, g2, be2)

    def full_spec(shape):
        n = len(shape)
        return pl.BlockSpec(shape, lambda b, _n=n: (0,) * _n)

    in_specs = [
        pl.BlockSpec((1, S, E), lambda b: (b, 0, 0)),        # hidden_states
        pl.BlockSpec((1, 1, 1, S), lambda b: (b, 0, 0, 0)),  # attention_mask
    ] + [full_spec(p.shape) for p in packed]

    kernel = functools.partial(encoder_layer_kernel, num_heads=num_heads)

    return pl.pallas_call(
        kernel,
        out_shape=jax.ShapeDtypeStruct((B, S, E), x.dtype),
        grid_spec=pltpu.PrefetchScalarGridSpec(
            num_scalar_prefetch=0,
            grid=(B,),
            in_specs=in_specs,
            out_specs=pl.BlockSpec((1, S, E), lambda b: (b, 0, 0)),
        ),
        compiler_params=pltpu.CompilerParams(dimension_semantics=("parallel",)),
    )(x, mask, *packed)


# --- pure-JAX reference (mirrors the PyTorch forward) for a sanity check ------
def encoder_layer_ref(x, mask, params, *, num_heads):
    (wq, bq, wk, bk, wv, bv, wo, bo, g1, be1, w1, bb1, w2, bb2, g2, be2) = params
    B, S, E = x.shape
    H = wq.shape[1]
    dh = H // num_heads

    def split_heads(t):  # [B, S, H] -> [B, nH, S, dh]
        return t.reshape(B, S, num_heads, dh).transpose(0, 2, 1, 3)

    q = split_heads(x @ wq + bq)
    k = split_heads(x @ wk + bk)
    v = split_heads(x @ wv + bv)
    scores = jnp.einsum('bhqd,bhkd->bhqk', q, k) / jnp.sqrt(jnp.float32(dh))
    scores = scores + mask
    probs = jax.nn.softmax(scores, axis=-1)
    ctx = jnp.einsum('bhqk,bhkd->bhqd', probs, v).transpose(0, 2, 1, 3).reshape(B, S, H)
    attn_out = _layer_norm(ctx @ wo + bo + x, g1, be1)
    ff = jnp.maximum(attn_out @ w1 + bb1, 0.0) @ w2 + bb2
    return _layer_norm(ff + attn_out, g2, be2)


if __name__ == "__main__":
    # config: embedding_size=32, hidden_size=32, num_attention_heads=4,
    #         intermediate_size=64; batch=2, seq=8
    B, S, E, H, NH, I = 2, 8, 32, 32, 4, 64

    key = jax.random.PRNGKey(0)
    ks = jax.random.split(key, 12)

    def lin(kw, din, dout):
        w = (jax.random.normal(kw, (din, dout), jnp.float32) * 0.05)
        b = jnp.zeros((1, dout), jnp.float32)
        return w, b

    wq, bq = lin(ks[0], E, H)
    wk, bk = lin(ks[1], E, H)
    wv, bv = lin(ks[2], E, H)
    wo, bo = lin(ks[3], H, E)
    w1, bb1 = lin(ks[4], E, I)
    w2, bb2 = lin(ks[5], I, E)
    g1, be1 = jnp.ones((1, E), jnp.float32), jnp.zeros((1, E), jnp.float32)
    g2, be2 = jnp.ones((1, E), jnp.float32), jnp.zeros((1, E), jnp.float32)
    params = (wq, bq, wk, bk, wv, bv, wo, bo, g1, be1, w1, bb1, w2, bb2, g2, be2)

    x = jax.random.normal(ks[6], (B, S, E), jnp.float32)
    # additive mask: last 2 key positions masked out for batch 1
    mask = jnp.zeros((B, 1, 1, S), jnp.float32)
    mask = mask.at[1, 0, 0, -2:].set(-1e9)

    out = encoder_layer(x, mask, params, num_heads=NH)
    out = jax.block_until_ready(out)

    ref = encoder_layer_ref(x, mask, params, num_heads=NH)
    assert out.shape == (B, S, E)
    assert jnp.allclose(out, ref, rtol=2e-3, atol=2e-3), "mismatch vs reference"

    # TODO(synk): nn.Dropout is treated as identity (eval-mode semantics).
    print("KERNEL_OK")
</pallas_src>

<mosaic_0001>
module attributes {stable_mosaic.version = 11 : i64} {
  func.func @encoder_layer_kernel(%arg0: i32, %arg1: memref<1x8x32xf32, #tpu.memory_space<vmem>>, %arg2: memref<1x1x1x8xf32, #tpu.memory_space<vmem>>, %arg3: memref<32x96xf32, #tpu.memory_space<vmem>>, %arg4: memref<1x96xf32, #tpu.memory_space<vmem>>, %arg5: memref<4x8x32xf32, #tpu.memory_space<vmem>>, %arg6: memref<1x32xf32, #tpu.memory_space<vmem>>, %arg7: memref<1x32xf32, #tpu.memory_space<vmem>>, %arg8: memref<1x32xf32, #tpu.memory_space<vmem>>, %arg9: memref<32x64xf32, #tpu.memory_space<vmem>>, %arg10: memref<1x64xf32, #tpu.memory_space<vmem>>, %arg11: memref<64x32xf32, #tpu.memory_space<vmem>>, %arg12: memref<1x32xf32, #tpu.memory_space<vmem>>, %arg13: memref<1x32xf32, #tpu.memory_space<vmem>>, %arg14: memref<1x32xf32, #tpu.memory_space<vmem>>, %arg15: memref<1x8x32xf32, #tpu.memory_space<vmem>>) attributes {dimension_semantics = [#tpu.dimension_semantics<parallel>], iteration_bounds = array<i64: 2>, scalar_prefetch = 0 : i64, scratch_operands = 0 : i64, tpu.core_type = #tpu.core_type<tc>, window_params = [{transform_indices = @transform_0, window_bounds = array<i64: 1, 8, 32>}, {transform_indices = @transform_1, window_bounds = array<i64: 1, 1, 1, 8>}, {pipeline_mode = #tpu.pipeline_mode<synchronous>, transform_indices = @transform_2, window_bounds = array<i64: 32, 96>}, {pipeline_mode = #tpu.pipeline_mode<synchronous>, transform_indices = @transform_3, window_bounds = array<i64: 1, 96>}, {pipeline_mode = #tpu.pipeline_mode<synchronous>, transform_indices = @transform_4, window_bounds = array<i64: 4, 8, 32>}, {pipeline_mode = #tpu.pipeline_mode<synchronous>, transform_indices = @transform_5, window_bounds = array<i64: 1, 32>}, {pipeline_mode = #tpu.pipeline_mode<synchronous>, transform_indices = @transform_6, window_bounds = array<i64: 1, 32>}, {pipeline_mode = #tpu.pipeline_mode<synchronous>, transform_indices = @transform_7, window_bounds = array<i64: 1, 32>}, {pipeline_mode = #tpu.pipeline_mode<synchronous>, transform_indices = @transform_8, window_bounds = array<i64: 32, 64>}, {pipeline_mode = #tpu.pipeline_mode<synchronous>, transform_indices = @transform_9, window_bounds = array<i64: 1, 64>}, {pipeline_mode = #tpu.pipeline_mode<synchronous>, transform_indices = @transform_10, window_bounds = array<i64: 64, 32>}, {pipeline_mode = #tpu.pipeline_mode<synchronous>, transform_indices = @transform_11, window_bounds = array<i64: 1, 32>}, {pipeline_mode = #tpu.pipeline_mode<synchronous>, transform_indices = @transform_12, window_bounds = array<i64: 1, 32>}, {pipeline_mode = #tpu.pipeline_mode<synchronous>, transform_indices = @transform_13, window_bounds = array<i64: 1, 32>}, {transform_indices = @transform_14, window_bounds = array<i64: 1, 8, 32>}]} {
    %c0 = arith.constant 0 : index
    %c0_0 = arith.constant 0 : index
    %c0_1 = arith.constant 0 : index
    %0 = vector.load %arg1[%c0, %c0_0, %c0_1] : memref<1x8x32xf32, #tpu.memory_space<vmem>>, vector<1x8x32xf32>
    %1 = vector.shape_cast %0 : vector<1x8x32xf32> to vector<8x32xf32>
    %c0_2 = arith.constant 0 : index
    %c0_3 = arith.constant 0 : index
    %c0_4 = arith.constant 0 : index
    %c0_5 = arith.constant 0 : index
    %2 = vector.load %arg2[%c0_2, %c0_3, %c0_4, %c0_5] : memref<1x1x1x8xf32, #tpu.memory_space<vmem>>, vector<1x1x1x8xf32>
    %3 = vector.shape_cast %2 : vector<1x1x1x8xf32> to vector<1x8xf32>
    %c0_6 = arith.constant 0 : index
    %c0_7 = arith.constant 0 : index
    %4 = vector.load %arg3[%c0_6, %c0_7] : memref<32x96xf32, #tpu.memory_space<vmem>>, vector<32x96xf32>
    %cst = arith.constant dense<0.000000e+00> : vector<8x96xf32>
    %5 = tpu.matmul %1, %4, %cst {dimension_numbers = #tpu.dot_dimension_numbers<[1], [0], [0], [1], [0, 0, 1, 1], [], []>} : vector<8x32xf32>, vector<32x96xf32>, vector<8x96xf32> -> vector<8x96xf32>
    %c0_8 = arith.constant 0 : index
    %c0_9 = arith.constant 0 : index
    %6 = vector.load %arg4[%c0_8, %c0_9] : memref<1x96xf32, #tpu.memory_space<vmem>>, vector<1x96xf32>
    %7 = vector.broadcast %6 : vector<1x96xf32> to vector<8x96xf32>
    %8 = arith.addf %5, %7 : vector<8x96xf32>
    %9 = vector.extract_strided_slice %8 {offsets = [0, 0], sizes = [8, 8], strides = [1, 1]} : vector<8x96xf32> to vector<8x8xf32>
    %10 = vector.extract_strided_slice %8 {offsets = [0, 8], sizes = [8, 8], strides = [1, 1]} : vector<8x96xf32> to vector<8x8xf32>
    %11 = vector.extract_strided_slice %8 {offsets = [0, 16], sizes = [8, 8], strides = [1, 1]} : vector<8x96xf32> to vector<8x8xf32>
    %12 = vector.extract_strided_slice %8 {offsets = [0, 24], sizes = [8, 8], strides = [1, 1]} : vector<8x96xf32> to vector<8x8xf32>
    %13 = vector.shape_cast %9 : vector<8x8xf32> to vector<1x8x8xf32>
    %14 = vector.shape_cast %10 : vector<8x8xf32> to vector<1x8x8xf32>
    %15 = vector.shape_cast %11 : vector<8x8xf32> to vector<1x8x8xf32>
    %16 = vector.shape_cast %12 : vector<8x8xf32> to vector<1x8x8xf32>
    %17 = tpu.concatenate %13, %14, %15, %16 in 0 : vector<1x8x8xf32>, vector<1x8x8xf32>, vector<1x8x8xf32>, vector<1x8x8xf32> -> vector<4x8x8xf32>
    %18 = vector.extract_strided_slice %8 {offsets = [0, 32], sizes = [8, 8], strides = [1, 1]} : vector<8x96xf32> to vector<8x8xf32>
    %19 = vector.extract_strided_slice %8 {offsets = [0, 40], sizes = [8, 8], strides = [1, 1]} : vector<8x96xf32> to vector<8x8xf32>
    %20 = vector.extract_strided_slice %8 {offsets = [0, 48], sizes = [8, 8], strides = [1, 1]} : vector<8x96xf32> to vector<8x8xf32>
    %21 = vector.extract_strided_slice %8 {offsets = [0, 56], sizes = [8, 8], strides = [1, 1]} : vector<8x96xf32> to vector<8x8xf32>
    %22 = vector.shape_cast %18 : vector<8x8xf32> to vector<1x8x8xf32>
    %23 = vector.shape_cast %19 : vector<8x8xf32> to vector<1x8x8xf32>
    %24 = vector.shape_cast %20 : vector<8x8xf32> to vector<1x8x8xf32>
    %25 = vector.shape_cast %21 : vector<8x8xf32> to vector<1x8x8xf32>
    %26 = tpu.concatenate %22, %23, %24, %25 in 0 : vector<1x8x8xf32>, vector<1x8x8xf32>, vector<1x8x8xf32>, vector<1x8x8xf32> -> vector<4x8x8xf32>
    %27 = vector.extract_strided_slice %8 {offsets = [0, 64], sizes = [8, 8], strides = [1, 1]} : vector<8x96xf32> to vector<8x8xf32>
    %28 = vector.extract_strided_slice %8 {offsets = [0, 72], sizes = [8, 8], strides = [1, 1]} : vector<8x96xf32> to vector<8x8xf32>
    %29 = vector.extract_strided_slice %8 {offsets = [0, 80], sizes = [8, 8], strides = [1, 1]} : vector<8x96xf32> to vector<8x8xf32>
    %30 = vector.extract_strided_slice %8 {offsets = [0, 88], sizes = [8, 8], strides = [1, 1]} : vector<8x96xf32> to vector<8x8xf32>
    %31 = vector.shape_cast %27 : vector<8x8xf32> to vector<1x8x8xf32>
    %32 = vector.shape_cast %28 : vector<8x8xf32> to vector<1x8x8xf32>
    %33 = vector.shape_cast %29 : vector<8x8xf32> to vector<1x8x8xf32>
    %34 = vector.shape_cast %30 : vector<8x8xf32> to vector<1x8x8xf32>
    %35 = tpu.concatenate %31, %32, %33, %34 in 0 : vector<1x8x8xf32>, vector<1x8x8xf32>, vector<1x8x8xf32>, vector<1x8x8xf32> -> vector<4x8x8xf32>
    "tpu.trace_start"() <{level = 10 : i32, message = "hqd,hkd->hqk"}> : () -> ()
    %cst_10 = arith.constant dense<0.000000e+00> : vector<4x8x8xf32>
    %36 = tpu.matmul %17, %26, %cst_10 {dimension_numbers = #tpu.dot_dimension_numbers<[2], [2], [1], [1], [0, 0, 0, 1, 1, 1], [0], [0]>} : vector<4x8x8xf32>, vector<4x8x8xf32>, vector<4x8x8xf32> -> vector<4x8x8xf32>
    "tpu.trace_stop"() : () -> ()
    %37 = vector.shape_cast %3 : vector<1x8xf32> to vector<1x1x8xf32>
    %38 = vector.broadcast %37 : vector<1x1x8xf32> to vector<4x8x8xf32>
    %39 = arith.addf %36, %38 : vector<4x8x8xf32>
    %cst_11 = arith.constant dense<0xFF800000> : vector<4x8xf32>
    %40 = vector.multi_reduction <maximumf>, %39, %cst_11 [2] : vector<4x8x8xf32> to vector<4x8xf32>
    %41 = vector.shape_cast %40 : vector<4x8xf32> to vector<4x8x1xf32>
    %42 = vector.broadcast %41 : vector<4x8x1xf32> to vector<4x8x8xf32>
    %43 = arith.subf %39, %42 : vector<4x8x8xf32>
    %44 = math.exp %43 : vector<4x8x8xf32>
    %cst_12 = arith.constant dense<0.000000e+00> : vector<4x8xf32>
    %45 = vector.multi_reduction <add>, %44, %cst_12 [2] : vector<4x8x8xf32> to vector<4x8xf32>
    %46 = vector.shape_cast %45 : vector<4x8xf32> to vector<4x8x1xf32>
    %47 = tpu.reciprocal %46 {approx = true} : vector<4x8x1xf32> -> vector<4x8x1xf32>
    %48 = vector.broadcast %47 : vector<4x8x1xf32> to vector<4x8x8xf32>
    %49 = arith.mulf %44, %48 : vector<4x8x8xf32>
    "tpu.trace_start"() <{level = 10 : i32, message = "hqk,hkd->hqd"}> : () -> ()
    %cst_13 = arith.constant dense<0.000000e+00> : vector<4x8x8xf32>
    %50 = tpu.matmul %49, %35, %cst_13 {dimension_numbers = #tpu.dot_dimension_numbers<[2], [1], [1], [2], [0, 0, 0, 1, 1, 2], [0], [0]>} : vector<4x8x8xf32>, vector<4x8x8xf32>, vector<4x8x8xf32> -> vector<4x8x8xf32>
    "tpu.trace_stop"() : () -> ()
    %c0_14 = arith.constant 0 : index
    %c0_15 = arith.constant 0 : index
    %c0_16 = arith.constant 0 : index
    %51 = vector.load %arg5[%c0_14, %c0_15, %c0_16] : memref<4x8x32xf32, #tpu.memory_space<vmem>>, vector<4x8x32xf32>
    "tpu.trace_start"() <{level = 10 : i32, message = "hqd,hde->hqe"}> : () -> ()
    %cst_17 = arith.constant dense<0.000000e+00> : vector<4x8x32xf32>
    %52 = tpu.matmul %50, %51, %cst_17 {dimension_numbers = #tpu.dot_dimension_numbers<[2], [1], [1], [2], [0, 0, 0, 1, 1, 2], [0], [0]>} : vector<4x8x8xf32>, vector<4x8x32xf32>, vector<4x8x32xf32> -> vector<4x8x32xf32>
    "tpu.trace_stop"() : () -> ()
    %cst_18 = arith.constant dense<0.000000e+00> : vector<8x32xf32>
    %53 = vector.multi_reduction <add>, %52, %cst_18 [0] : vector<4x8x32xf32> to vector<8x32xf32>
    %c0_19 = arith.constant 0 : index
    %c0_20 = arith.constant 0 : index
    %54 = vector.load %arg6[%c0_19, %c0_20] : memref<1x32xf32, #tpu.memory_space<vmem>>, vector<1x32xf32>
    %55 = vector.broadcast %54 : vector<1x32xf32> to vector<8x32xf32>
    %56 = arith.addf %53, %55 : vector<8x32xf32>
    %57 = arith.addf %56, %1 : vector<8x32xf32>
    %c0_21 = arith.constant 0 : index
    %c0_22 = arith.constant 0 : index
    %58 = vector.load %arg7[%c0_21, %c0_22] : memref<1x32xf32, #tpu.memory_space<vmem>>, vector<1x32xf32>
    %c0_23 = arith.constant 0 : index
    %c0_24 = arith.constant 0 : index
    %59 = vector.load %arg8[%c0_23, %c0_24] : memref<1x32xf32, #tpu.memory_space<vmem>>, vector<1x32xf32>
    %cst_25 = arith.constant dense<0.000000e+00> : vector<8xf32>
    %60 = vector.multi_reduction <add>, %57, %cst_25 [1] : vector<8x32xf32> to vector<8xf32>
    %61 = vector.shape_cast %60 : vector<8xf32> to vector<8x1xf32>
    %cst_26 = arith.constant 3.200000e+01 : f32
    %62 = vector.broadcast %cst_26 : f32 to vector<8x1xf32>
    %63 = arith.divf %61, %62 : vector<8x1xf32>
    %64 = vector.broadcast %63 : vector<8x1xf32> to vector<8x32xf32>
    %65 = arith.subf %57, %64 : vector<8x32xf32>
    %66 = arith.mulf %65, %65 : vector<8x32xf32>
    %cst_27 = arith.constant dense<0.000000e+00> : vector<8xf32>
    %67 = vector.multi_reduction <add>, %66, %cst_27 [1] : vector<8x32xf32> to vector<8xf32>
    %68 = vector.shape_cast %67 : vector<8xf32> to vector<8x1xf32>
    %cst_28 = arith.constant 3.200000e+01 : f32
    %69 = vector.broadcast %cst_28 : f32 to vector<8x1xf32>
    %70 = arith.divf %68, %69 : vector<8x1xf32>
    %cst_29 = arith.constant 9.99999996E-13 : f32
    %71 = vector.broadcast %cst_29 : f32 to vector<8x1xf32>
    %72 = arith.addf %70, %71 : vector<8x1xf32>
    %73 = math.rsqrt %72 : vector<8x1xf32>
    %74 = vector.broadcast %73 : vector<8x1xf32> to vector<8x32xf32>
    %75 = arith.mulf %65, %74 : vector<8x32xf32>
    %76 = vector.broadcast %58 : vector<1x32xf32> to vector<8x32xf32>
    %77 = arith.mulf %76, %75 : vector<8x32xf32>
    %78 = vector.broadcast %59 : vector<1x32xf32> to vector<8x32xf32>
    %79 = arith.addf %77, %78 : vector<8x32xf32>
    %c0_30 = arith.constant 0 : index
    %c0_31 = arith.constant 0 : index
    %80 = vector.load %arg9[%c0_30, %c0_31] : memref<32x64xf32, #tpu.memory_space<vmem>>, vector<32x64xf32>
    %cst_32 = arith.constant dense<0.000000e+00> : vector<8x64xf32>
    %81 = tpu.matmul %79, %80, %cst_32 {dimension_numbers = #tpu.dot_dimension_numbers<[1], [0], [0], [1], [0, 0, 1, 1], [], []>} : vector<8x32xf32>, vector<32x64xf32>, vector<8x64xf32> -> vector<8x64xf32>
    %c0_33 = arith.constant 0 : index
    %c0_34 = arith.constant 0 : index
    %82 = vector.load %arg10[%c0_33, %c0_34] : memref<1x64xf32, #tpu.memory_space<vmem>>, vector<1x64xf32>
    %83 = vector.broadcast %82 : vector<1x64xf32> to vector<8x64xf32>
    %84 = arith.addf %81, %83 : vector<8x64xf32>
    %cst_35 = arith.constant 0.000000e+00 : f32
    %85 = vector.broadcast %cst_35 : f32 to vector<8x64xf32>
    %86 = arith.maximumf %84, %85 : vector<8x64xf32>
    %c0_36 = arith.constant 0 : index
    %c0_37 = arith.constant 0 : index
    %87 = vector.load %arg11[%c0_36, %c0_37] : memref<64x32xf32, #tpu.memory_space<vmem>>, vector<64x32xf32>
    %cst_38 = arith.constant dense<0.000000e+00> : vector<8x32xf32>
    %88 = tpu.matmul %86, %87, %cst_38 {dimension_numbers = #tpu.dot_dimension_numbers<[1], [0], [0], [1], [0, 0, 1, 1], [], []>} : vector<8x64xf32>, vector<64x32xf32>, vector<8x32xf32> -> vector<8x32xf32>
    %c0_39 = arith.constant 0 : index
    %c0_40 = arith.constant 0 : index
    %89 = vector.load %arg12[%c0_39, %c0_40] : memref<1x32xf32, #tpu.memory_space<vmem>>, vector<1x32xf32>
    %90 = vector.broadcast %89 : vector<1x32xf32> to vector<8x32xf32>
    %91 = arith.addf %88, %90 : vector<8x32xf32>
    %92 = arith.addf %91, %79 : vector<8x32xf32>
    %c0_41 = arith.constant 0 : index
    %c0_42 = arith.constant 0 : index
    %93 = vector.load %arg13[%c0_41, %c0_42] : memref<1x32xf32, #tpu.memory_space<vmem>>, vector<1x32xf32>
    %c0_43 = arith.constant 0 : index
    %c0_44 = arith.constant 0 : index
    %94 = vector.load %arg14[%c0_43, %c0_44] : memref<1x32xf32, #tpu.memory_space<vmem>>, vector<1x32xf32>
    %cst_45 = arith.constant dense<0.000000e+00> : vector<8xf32>
    %95 = vector.multi_reduction <add>, %92, %cst_45 [1] : vector<8x32xf32> to vector<8xf32>
    %96 = vector.shape_cast %95 : vector<8xf32> to vector<8x1xf32>
    %cst_46 = arith.constant 3.200000e+01 : f32
    %97 = vector.broadcast %cst_46 : f32 to vector<8x1xf32>
    %98 = arith.divf %96, %97 : vector<8x1xf32>
    %99 = vector.broadcast %98 : vector<8x1xf32> to vector<8x32xf32>
    %100 = arith.subf %92, %99 : vector<8x32xf32>
    %101 = arith.mulf %100, %100 : vector<8x32xf32>
    %cst_47 = arith.constant dense<0.000000e+00> : vector<8xf32>
    %102 = vector.multi_reduction <add>, %101, %cst_47 [1] : vector<8x32xf32> to vector<8xf32>
    %103 = vector.shape_cast %102 : vector<8xf32> to vector<8x1xf32>
    %cst_48 = arith.constant 3.200000e+01 : f32
    %104 = vector.broadcast %cst_48 : f32 to vector<8x1xf32>
    %105 = arith.divf %103, %104 : vector<8x1xf32>
    %cst_49 = arith.constant 9.99999996E-13 : f32
    %106 = vector.broadcast %cst_49 : f32 to vector<8x1xf32>
    %107 = arith.addf %105, %106 : vector<8x1xf32>
    %108 = math.rsqrt %107 : vector<8x1xf32>
    %109 = vector.broadcast %108 : vector<8x1xf32> to vector<8x32xf32>
    %110 = arith.mulf %100, %109 : vector<8x32xf32>
    %111 = vector.broadcast %93 : vector<1x32xf32> to vector<8x32xf32>
    %112 = arith.mulf %111, %110 : vector<8x32xf32>
    %113 = vector.broadcast %94 : vector<1x32xf32> to vector<8x32xf32>
    %114 = arith.addf %112, %113 : vector<8x32xf32>
    %c0_50 = arith.constant 0 : index
    %c0_51 = arith.constant 0 : index
    %c0_52 = arith.constant 0 : index
    %115 = vector.load %arg15[%c0_50, %c0_51, %c0_52] : memref<1x8x32xf32, #tpu.memory_space<vmem>>, vector<1x8x32xf32>
    %116 = vector.shape_cast %115 : vector<1x8x32xf32> to vector<8x32xf32>
    %117 = vector.shape_cast %114 : vector<8x32xf32> to vector<1x8x32xf32>
    tpu.vector_store %arg15[%c0_50, %c0_51, %c0_52], %117 {strides = array<i32>} : memref<1x8x32xf32, #tpu.memory_space<vmem>>, vector<1x8x32xf32>,
    return
  }
  func.func @transform_0(%arg0: i32) -> (i32, i32, i32) {
    %c0_i32 = arith.constant 0 : i32
    %c0_i32_0 = arith.constant 0 : i32
    %c0_i32_1 = arith.constant 0 : i32
    return %arg0, %c0_i32, %c0_i32_0 : i32, i32, i32
  }
  func.func @transform_1(%arg0: i32) -> (i32, i32, i32, i32) {
    %c0_i32 = arith.constant 0 : i32
    %c0_i32_0 = arith.constant 0 : i32
    %c0_i32_1 = arith.constant 0 : i32
    %c0_i32_2 = arith.constant 0 : i32
    return %arg0, %c0_i32, %c0_i32_0, %c0_i32_1 : i32, i32, i32, i32
  }
  func.func @transform_2(%arg0: i32) -> (i32, i32) {
    %c0_i32 = arith.constant 0 : i32
    %c0_i32_0 = arith.constant 0 : i32
    %c0_i32_1 = arith.constant 0 : i32
    return %c0_i32, %c0_i32_0 : i32, i32
  }
  func.func @transform_3(%arg0: i32) -> (i32, i32) {
    %c0_i32 = arith.constant 0 : i32
    %c0_i32_0 = arith.constant 0 : i32
    %c0_i32_1 = arith.constant 0 : i32
    return %c0_i32, %c0_i32_0 : i32, i32
  }
  func.func @transform_4(%arg0: i32) -> (i32, i32, i32) {
    %c0_i32 = arith.constant 0 : i32
    %c0_i32_0 = arith.constant 0 : i32
    %c0_i32_1 = arith.constant 0 : i32
    %c0_i32_2 = arith.constant 0 : i32
    return %c0_i32, %c0_i32_0, %c0_i32_1 : i32, i32, i32
  }
  func.func @transform_5(%arg0: i32) -> (i32, i32) {
    %c0_i32 = arith.constant 0 : i32
    %c0_i32_0 = arith.constant 0 : i32
    %c0_i32_1 = arith.constant 0 : i32
    return %c0_i32, %c0_i32_0 : i32, i32
  }
  func.func @transform_6(%arg0: i32) -> (i32, i32) {
    %c0_i32 = arith.constant 0 : i32
    %c0_i32_0 = arith.constant 0 : i32
    %c0_i32_1 = arith.constant 0 : i32
    return %c0_i32, %c0_i32_0 : i32, i32
  }
  func.func @transform_7(%arg0: i32) -> (i32, i32) {
    %c0_i32 = arith.constant 0 : i32
    %c0_i32_0 = arith.constant 0 : i32
    %c0_i32_1 = arith.constant 0 : i32
    return %c0_i32, %c0_i32_0 : i32, i32
  }
  func.func @transform_8(%arg0: i32) -> (i32, i32) {
    %c0_i32 = arith.constant 0 : i32
    %c0_i32_0 = arith.constant 0 : i32
    %c0_i32_1 = arith.constant 0 : i32
    return %c0_i32, %c0_i32_0 : i32, i32
  }
  func.func @transform_9(%arg0: i32) -> (i32, i32) {
    %c0_i32 = arith.constant 0 : i32
    %c0_i32_0 = arith.constant 0 : i32
    %c0_i32_1 = arith.constant 0 : i32
    return %c0_i32, %c0_i32_0 : i32, i32
  }
  func.func @transform_10(%arg0: i32) -> (i32, i32) {
    %c0_i32 = arith.constant 0 : i32
    %c0_i32_0 = arith.constant 0 : i32
    %c0_i32_1 = arith.constant 0 : i32
    return %c0_i32, %c0_i32_0 : i32, i32
  }
  func.func @transform_11(%arg0: i32) -> (i32, i32) {
    %c0_i32 = arith.constant 0 : i32
    %c0_i32_0 = arith.constant 0 : i32
    %c0_i32_1 = arith.constant 0 : i32
    return %c0_i32, %c0_i32_0 : i32, i32
  }
  func.func @transform_12(%arg0: i32) -> (i32, i32) {
    %c0_i32 = arith.constant 0 : i32
    %c0_i32_0 = arith.constant 0 : i32
    %c0_i32_1 = arith.constant 0 : i32
    return %c0_i32, %c0_i32_0 : i32, i32
  }
  func.func @transform_13(%arg0: i32) -> (i32, i32) {
    %c0_i32 = arith.constant 0 : i32
    %c0_i32_0 = arith.constant 0 : i32
    %c0_i32_1 = arith.constant 0 : i32
    return %c0_i32, %c0_i32_0 : i32, i32
  }
  func.func @transform_14(%arg0: i32) -> (i32, i32, i32) {
    %c0_i32 = arith.constant 0 : i32
    %c0_i32_0 = arith.constant 0 : i32
    %c0_i32_1 = arith.constant 0 : i32
    return %arg0, %c0_i32, %c0_i32_0 : i32, i32, i32
  }
}

</mosaic_0001>

<bundles_post_ra>
// kernel: tpu_custom_call.1
= control target key start
LH: loop header
LB: loop body
LE: loop exit
PB: predicated region body
PF: predicated region fallthrough
CT: control target
= control target key end

     0   :  { %s2902_s0 = inlined_call_operand.hbm [shape: f32[2,8,32], index: 0, kind: input, shape index: {}]   ;;  %s2903_s1 = inlined_call_operand.vmem [shape: f32[2,1,1,8], index: 1, kind: input, shape index: {}]   ;;  %s2904_s2 = inlined_call_operand.vmem [shape: f32[32,96], index: 2, kind: input, shape index: {}]   ;;  %s2905_s3 = inlined_call_operand.vmem [shape: f32[1,96], index: 3, kind: input, shape index: {}]   ;;  %s2906_s4 = inlined_call_operand.vmem [shape: f32[4,8,32], index: 4, kind: input, shape index: {}]   ;;  %s2907_s5 = inlined_call_operand.vmem [shape: f32[1,32], index: 5, kind: input, shape index: {}]   ;;  %s2908_s6 = inlined_call_operand.vmem [shape: f32[1,32], index: 6, kind: input, shape index: {}]   ;;  %s2909_s7 = inlined_call_operand.hbm [shape: f32[1,32], index: 7, kind: input, shape index: {}]   ;;  %s2910_s8 = inlined_call_operand.vmem [shape: f32[32,64], index: 8, kind: input, shape index: {}]   ;;  %s2911_s9 = inlined_call_operand.hbm [shape: f32[1,64], index: 9, kind: input, shape index: {}]   ;;  %s2912_s10 = inlined_call_operand.vmem [shape: f32[64,32], index: 10, kind: input, shape index: {}]   ;;  %s2913_s11 = inlined_call_operand.vmem [shape: f32[1,32], index: 11, kind: input, shape index: {}]   ;;  %s2914_s12 = inlined_call_operand.vmem [shape: f32[1,32], index: 12, kind: input, shape index: {}]   ;;  %s2915_s13 = inlined_call_operand.vmem [shape: f32[1,32], index: 13, kind: input, shape index: {}]   ;;  %s2916_s14 = inlined_call_operand.hbm [shape: f32[2,8,32], index: 14, kind: output, shape index: {}]  }
   0x1   :  { %2923 = sst [smem:[#allocation14_spill]] %s2902_s0 }
   0x2   :  { %2924 = sst [smem:[#allocation15_spill]] %s2903_s1 }
   0x3   :  { %2925 = sst [smem:[#allocation16_spill]] %s2909_s7 }
   0x4   :  { %2926 = sst [smem:[#allocation17_spill]] %s2914_s12 }
   0x5   :  { %2927 = sst [smem:[#allocation18_spill]] %s2915_s13 }
   0x6   :  { %2928 = sst [smem:[#allocation19_spill]] %s2916_s14 }
   0x7   :  { %19 = vsyncpa [#allocation3], 0 }
   0x8   :  { %21 = vsyncpa [#allocation3 + $0x1], 0 }
   0x9   :  { %22 = vsyncpa [#allocation6], 0 }
   0xa   :  { %23 = vsyncpa [#allocation4], 0 }
   0xb   :  { %25 = vsyncpa [#allocation4 + $0x1], 0  ;;  %s2486_s29 = smov 0   ;;  %s2488_s30 = smov 0  }
   0xc   :  { %s2490_s15 = smov 0   ;;  %s2492_s16 = smov 0  }
   0xd LB: > { %2929 = sst [smem:[#allocation12_spill]] %s2385_s29  ;;  %s2507_s17 = sadd.s32 4294967295, %s2397_s16   ;;  %s2397_s16 = sphi %s2492_s16, %s2956_s16   ;;  %s2393_s15 = sphi %s2490_s15, %s2955_s15   ;;  %s2389_s30 = sphi %s2488_s30, %s2954_s30   ;;  %s2385_s29 = sphi %s2486_s29, %s2953_s29  }
   0xe   : > { %s1934_s18 = sadd.s32 4294967294, %s2397_s16   ;;  %p51_p0 = scmp.ne.s32.totalorder %s2389_s30, %s2385_s29 }
   0xf   : > { %p2920_p1 = scmp.eq.s32.totalorder %s2507_s17, 0  ;;  %p359_p3 = scmp.eq.s32.totalorder %s1934_s18, 1 }
  0x10   : > { %p1935_p5 = scmp.ge.s32.totalorder %s2397_s16, 1  ;;  %p366_p7 = scmp.lt.s32.totalorder %s2397_s16, 3 }
  0x11   : > { %p2516_p4 = por %p2920_p1, %p51_p0  ;;  %p2521_p6 = por %p359_p3, %p51_p0 }
  0x12   : > { %p2526_p8 = pnand %p1935_p5, %p366_p7  ;;  %s2399_s22 = smov [#allocation5]  }
  0x13   : > { %s2930_s19 = scalar_select %p2516_p4, 1, 0 }
  0x14   : > { %s2931_s20 = scalar_select %p2521_p6, 1, 0 }
  0x15   : > { %s2933_s21 = scalar_select %p2526_p8, 1, 0 }
  0x16   : > { %2932 = sst [smem:[#allocation13_spill]] %s2931_s20  ;;  %s394_s23 = sshll.u32 %s2399_s22, 4  ;;  %s395_s23 = int_to_ptr.vmem [resolvable:$true] %s394_s23 }
  0x17   : > { %p2158_p10 = pneg %p2526_p8  ;;  %s2400_s24 = smov [#allocation7]  }
  0x18   : > { %s408_s25 = sshll.u32 %s2400_s24, 4  ;;  %s2542_s27 = sadd.s32 1, %s2397_s16   ;;  %s2539_s25 = int_to_ptr.vmem [resolvable:$true] %s408_s25 }
  0x19   : > { %p2535_p11 = pnand %p2158_p10, %p2920_p1  ;;  %s2935_s7 = sld [smem:[#allocation16_spill]] }
  0x1b   : > { %p2243_p13 = pneg %p2535_p11 }
  0x1f   : > { %s2241_s20 = scalar_lea.hbm %s2935_s7, 16 }
  0x20   : > { %p2242_p12 = scmp.ne.s32.totalorder %s2935_s7, %s2241_s20  ;;  %p2248_p5 = scmp.lt.u32.totalorder %s2241_s20, %s2935_s7 }
  0x22   : > { %p2244_p0 = pnand %p2243_p13, %p2242_p12 }
  0x24   : > { %p2245_p3 = pneg %p2244_p0 }
  0x26   : > { %p2250_p7 = pnand %p2248_p5, %p2245_p3 }
  0x28   : > { %2253 = shalt.err (!%p2250_p7)
}
  0x29   : > { %s2254_s28 = scalar_lea.vmem %s395_s23, 16  ;;  %s2261_s14 = scalar_lea.vmem %s395_s23, 32 }
  0x2a   : > { %p2255_p10 = scmp.ne.s32.totalorder %s395_s23, %s2254_s28  ;;  %p2262_p2 = scmp.lt.s32.totalorder %s395_s23, %s395_s23 }
  0x2b   : > { %p2263_p6 = scmp.lt.s32.totalorder %s2261_s14, %s2254_s28 }
  0x2c   : > { %p2257_p9 = pnand %p2255_p10, %p2243_p13 }
  0x2d   : > { %p2264_p4 = por %p2263_p6, %p2262_p2 }
  0x2e   : > { %p2258_p1 = pneg %p2257_p9 }
  0x30   : > { %p2265_p8 = pnand %p2264_p4, %p2258_p1 }
  0x32   : > { %2268 = shalt.err (!%p2265_p8)
}
  0x33   : > { %2161 = dma.hbm_to_vmem [thread:$0]  (!%p2535_p11), %s2935_s7, 16, %s395_s23, [#allocation6]  }
  0x34   : > { %s2269_s22 = scalar_lea.hbm %s2911_s9, 16 }
  0x35   : > { %p2270_p9 = scmp.ne.s32.totalorder %s2911_s9, %s2269_s22  ;;  %p2276_p4 = scmp.lt.u32.totalorder %s2269_s22, %s2911_s9 }
  0x37   : > { %p2272_p2 = pnand %p2270_p9, %p2243_p13 }
  0x39   : > { %p2273_p1 = pneg %p2272_p2 }
  0x3b   : > { %p2278_p6 = pnand %p2276_p4, %p2273_p1 }
  0x3d   : > { %2281 = shalt.err (!%p2278_p6)
}
  0x3e   : > { %s2282_s23 = scalar_lea.vmem %s2539_s25, 16  ;;  %s2289_s12 = scalar_lea.vmem %s2539_s25, 32 }
  0x3f   : > { %p2283_p8 = scmp.ne.s32.totalorder %s2539_s25, %s2282_s23  ;;  %p2290_p3 = scmp.lt.s32.totalorder %s2539_s25, %s2539_s25 }
  0x40   : > { %p2291_p5 = scmp.lt.s32.totalorder %s2289_s12, %s2282_s23 }
  0x41   : > { %p2285_p12 = pnand %p2283_p8, %p2243_p13 }
  0x42   : > { %p2292_p7 = por %p2291_p5, %p2290_p3 }
  0x43   : > { %p2286_p0 = pneg %p2285_p12 }
  0x45   : > { %p2293_p10 = pnand %p2292_p7, %p2286_p0 }
  0x47   : > { %2296 = shalt.err (!%p2293_p10)
}
  0x48   : > { %2164 = dma.hbm_to_vmem [thread:$0]  (!%p2535_p11), %s2911_s9, 16, %s2539_s25, [#allocation6]  }
  0x49   : > { %s2936_s20 = ssub.s32 %s2397_s16, %s2542_s27  ;;  %s38_s18 = sadd.s32 1, %s2393_s15 }
  0x4a   : > { %p36_p13 = scmp.eq.s32.totalorder %s2936_s20, 0  ;;  %p45_p9 = scmp.ne.s32.totalorder %s2393_s15, %s2389_s30 }
  0x4b   : > { %p46_p2 = scmp.eq.s32.totalorder %s2397_s16, 0  ;;  %p2937_p4 = scmp.eq.s32.totalorder %s2507_s17, 1 }
  0x4c   : > { %s2602_s26 = scalar_select %p36_p13, %s2393_s15, %s38_s18  }
  0x4d   : > { %p47_p1 = por %p46_p2, %p45_p9  ;;  %p2606_p6 = por %p2937_p4, %p45_p9 }
  0x4e   : > { %p2175_p8 = scmp.lt.s32.totalorder %s2397_s16, 2  ;;  %s431_s24 = sand.u32 1, %s2393_s15  }
  0x4f   : > { %s1939_s28 = sshll.u32 %s431_s24, 3  ;;  %s1940_s14 = sshll.u32 %s2397_s16, 7 }
  0x50   : > { %s2939_s0 = sld [smem:[#allocation14_spill]]  ;;  %s435_s29 = scalar_lea.vmem [#allocation2], %s1939_s28 }
  0x51   : > { %s442_s13 = sshll.u32 %s435_s29, 4  ;;  %p2620_p11 = pnand %p2175_p8, %p47_p1  ;;  %s2618_s13 = int_to_ptr.vmem [resolvable:$true] %s442_s13 }
  0x52   : > { %s432_s18 = scalar_lea.sflag [#allocation3], %s431_s24 }
  0x53   : > { %p2299_p0 = pneg %p2620_p11 }
  0x56   : > { %s2616_s25 = scalar_lea.hbm %s2939_s0, %s1940_s14  ;;  %s2302_s23 = scalar_lea.hbm %s2939_s0, 256 }
  0x57   : > { %s2297_s7 = scalar_lea.hbm %s2616_s25, 128  ;;  %p2303_p7 = scmp.lt.u32.totalorder %s2616_s25, %s2939_s0 }
  0x58   : > { %p2298_p12 = scmp.ne.s32.totalorder %s2616_s25, %s2297_s7  ;;  %p2304_p10 = scmp.lt.u32.totalorder %s2302_s23, %s2297_s7 }
  0x59   : > { %p2306_p9 = scmp.lt.u32.totalorder %s2297_s7, %s2616_s25 }
  0x5a   : > { %p2300_p3 = pnand %p2299_p0, %p2298_p12  ;;  %p2305_p13 = por %p2304_p10, %p2303_p7 }
  0x5c   : > { %p2301_p5 = pneg %p2300_p3  ;;  %p2307_p2 = por %p2306_p9, %p2305_p13 }
  0x5e   : > { %p2308_p1 = pnand %p2307_p2, %p2301_p5 }
  0x60   : > { %2311 = shalt.err (!%p2308_p1)
}
  0x61   : > { %s2312_s24 = scalar_lea.vmem %s2618_s13, 128  ;;  %s2401_s14 = smov [#allocation2]  }
  0x62   : > { %p2313_p4 = scmp.ne.s32.totalorder %s2618_s13, %s2312_s24  ;;  %s2317_s28 = sshll.u32 %s2401_s14, 4  ;;  %s2318_s28 = int_to_ptr.vmem [resolvable:$false] %s2317_s28 }
  0x63   : > { %s2319_s12 = scalar_lea.vmem %s2318_s28, 256  ;;  %p2320_p3 = scmp.lt.s32.totalorder %s2618_s13, %s2318_s28 }
  0x64   : > { %p2315_p8 = pnand %p2313_p4, %p2299_p0  ;;  %p2321_p7 = scmp.lt.s32.totalorder %s2319_s12, %s2312_s24 }
  0x66   : > { %p2316_p12 = pneg %p2315_p8  ;;  %p2322_p10 = por %p2321_p7, %p2320_p3 }
  0x68   : > { %p2323_p13 = pnand %p2322_p10, %p2316_p12 }
  0x6a   : > { %2326 = shalt.err (!%p2323_p13)
}
  0x6b   : > { %2168 = dma.hbm_to_vmem [thread:$0]  (!%p2620_p11), %s2616_s25, 128, %s2618_s13, %s432_s18  }
  0x6c   : > { %p2941_p5 = scmp.ne.s32.totalorder %s2933_s21, 0 }
  0x6d   : > { %s2652_s7 = sand.u32 (!%p2941_p5), 1, %s2389_s30   ;;  %p2942_p0 = scmp.ne.s32.totalorder (!%p2941_p5), %s2930_s19, 0 }
  0x6e   : > { %457 = sbr.rel (%p2941_p5) target bundleno = 2616 (0xa38), region = 76  ;;  %s1942_s23 = sshll.u32 (!%p2941_p5), %s2652_s7, 3 }
  0x6f   : > { %s460_s29 = scalar_lea.sflag (!%p2941_p5), [#allocation3], %s2652_s7  ;;  %s463_s24 = scalar_lea.vmem (!%p2941_p5), [#allocation2], %s1942_s23 }
  0x75   : > { %2372 = dma.done.wait (%p2942_p0), %s460_s29, 128  }
  0x76   : > { %2374 = vsyncadd (%p2942_p0), %s460_s29, 4294967168  ;;  %p2943_p11 = scmp.eq.s32.totalorder %s2507_s17, 0 }
  0x78   : > { %2376 = dma.done.wait (%p2943_p11), [#allocation6], 32   ;;  %p2944_p9 = pmov %p2943_p11 }
  0x79   : > { %v2402_v0 = vmov 0.0|0.0   ;;  %vm2403_vm0 = vmmov 0   ;;  %v2404_v1 = vmov 0.0   ;;  %v524_v2 = vld [vmem:[%s2904_s2] sm:$0xff]  ;;  %v525_v3 = vld [vmem:[%s2904_s2 + $0x8] sm:$0xff]  ;;  %v526_v4 = vld [vmem:[%s2904_s2 + $0x10] sm:$0xff] }
  0x7a   : > { %2378 = vsyncadd (%p2944_p9), [#allocation6], 4294967264  ;;  %2122 = vmatprep.subr.bf16.mxu0 %v2402_v0  ;;  %2029 = vmatprep.mubr.msk.f32.mxu0 %vm2403_vm0, %v2404_v1  ;;  %v2123_v5 = vpack.c.bf16 %v525_v3, %v524_v2  ;;  %v527_v6 = vld [vmem:[%s2904_s2 + $0x18] sm:$0xff]  ;;  %v2685_v8 = vld [vmem:[%s463_s24] sm:$0xff]  ;;  %vm535_vm1 = vcmask 261120   ;;  %s2405_s19 = smov 104  }
  0x7b   : > { %2037 = vmatprep.subr.mxu1 %v2404_v1  ;;  %2039 = vmatprep.mubr.msk.f32.mxu1 %vm2403_vm0, %v2404_v1  ;;  %v2126_v7 = vpack.c.bf16 %v527_v6, %v526_v4  ;;  %v1946_v9 = vld [vmem:[%s2905_s3] ss:$0 sm:$0xff]  ;;  %s2406_s24 = smov 120   ;;  %s2407_s21 = smov 96   ;;  %vm624_vm2 = vcmask 64512   ;;  %vm1717_vm3 = vcmask 523264  }
  0x7c   : > { %2124 = vmatpush3.bf16.msra.mxu0 %v2123_v5  ;;  %s2408_s25 = smov 112   ;;  %p519_p2 = scmp.lt.s32.totalorder %s2507_s17, 1 }
  0x7d   : > { %2125 = vmatprep.subr.bf16.mxu0 %v2402_v0  ;;  %s2945_s1 = sld [smem:[#allocation15_spill]]  ;;  %s2409_s28 = smov 64  }
  0x7e   : > { %s520_s13 = scalar_select %p519_p2, %s2507_s17, 1 }
  0x7f   : > { %s2946_s20 = sld [smem:[#allocation17_spill]]  ;;  %s1975_s12 = sshll.u32 %s2507_s17, 7 }
  0x80   : > { %2127 = vmatpush3.bf16.msra.mxu0 %v2126_v7  ;;  %s518_s29 = scalar_lea.vmem [#allocation8], %s1942_s23  ;;  %s2948_s0 = sld [smem:[#allocation19_spill]] }
  0x81   : > { %2032 = vmatprep.subr.mxu0 %v2404_v1  ;;  %s2410_s17 = smov [#allocation8]  }
  0x82   : > { %s2331_s23 = sshll.u32 %s2410_s17, 4  ;;  %s2332_s23 = int_to_ptr.vmem [resolvable:$false] %s2331_s23 }
  0x83   : > { %2030 = vmatmul.mubr.msk.f32.vlgmr.msra.gmra.mrb[0].mxu0 %vm535_vm1, %v2685_v8  ;;  %s521_s14 = scalar_lea.vmem %s2945_s1, %s520_s13 }
  0x84   : > { %2034 = vmatprep.mubr.msk.f32.mxu0 %vm2403_vm0, %v2404_v1  ;;  %v1948_v20 = vld [vmem:[%s521_s14] ss:$0 sm:$0xff] }
  0x86   : > { %s2857_s1 = scalar_lea.hbm %s2948_s0, %s1975_s12 }
 0x156   : > { %v605_v10 = vpop.f32.mrb[0].mxu0 }
 0x157   : > { %v606_v11 = vadd.f32 %v1946_v9, %v605_v10  ;;  %v2031_v12 = vpop.f32.mrb[1].mxu0 }
 0x158   : > { %v1275_v12 = vld [vmem:[%s2906_s4] sm:$0xff] }
 0x159   : > { %614 = vrot.lane.b32.xlu1 %v606_v11, %s2405_s19  ;;  %610 = vrot.lane.b32.xlu0 %v606_v11, %s2406_s24  ;;  %s1836_s19 = sshll.u32 %s518_s29, 4  ;;  %s2859_s19 = int_to_ptr.vmem [resolvable:$true] %s1836_s19 }
 0x15a   : > { %s2327_s13 = scalar_lea.vmem %s2859_s19, 128  ;;  %p2334_p12 = scmp.lt.s32.totalorder %s2859_s19, %s2332_s23 }
 0x15b   : > { %p2328_p1 = scmp.ne.s32.totalorder %s2859_s19, %s2327_s13 }
 0x15d   : > { %622 = vrot.lane.b32.xlu1 %v606_v11, %s2407_s21  ;;  %612 = vrot.lane.b32.xlu0 %v606_v11, %s2408_s25  ;;  %s1823_s25 = scalar_lea.sflag [#allocation4], %s2652_s7  ;;  %p2329_p4 = pnand %p2328_p1, %p2606_p6 }
 0x15f   : > { %p2330_p8 = pneg %p2329_p4 }
 0x1cb   : > { %v2695_v13 = vpop.permute.xlu1 %614  ;;  %v611_v14 = vpop.permute.xlu0 %610 }
 0x1cc   : > { %699 = vrot.lane.b32.xlu0 %v611_v14, %s2407_s21 }
 0x1cf   : > { %v623_v15 = vpop.permute.xlu1 %622  ;;  %v2697_v16 = vpop.permute.xlu0 %612 }
 0x1d0   : > { %2033 = vmatpush3.xpose.msk.msra.mxu0 %vm624_vm2, %v623_v15  ;;  %851 = vrot.lane.b32.xlu0 %v2695_v13, %s2407_s21 }
 0x1d1   : > { %775 = vrot.lane.b32.xlu1 %v2697_v16, %s2407_s21  ;;  %2042 = vmatprep.subr.mxu0 %v2404_v1 }
 0x1d3   : > { %2035 = vmatmul.mubr.msk.f32.vlgmr.msra.gmra.mrb[2].mxu0 %vm624_vm2, %v606_v11 }
 0x1d4   : > { %2044 = vmatprep.mubr.msk.f32.mxu0 %vm2403_vm0, %v2404_v1 }
 0x23e   : > { %v700_v17 = vpop.permute.xlu0 %699 }
 0x23f   : > { %2038 = vmatpush3.xpose.msk.msra.mxu1 %vm624_vm2, %v700_v17  ;;  %v1278_v17 = vld [vmem:[%s2906_s4 + $0x18] sm:$0xff] }
 0x240   : > { %2047 = vmatprep.subr.mxu1 %v2404_v1 }
 0x242   : > { %2040 = vmatmul.mubr.msk.f32.vlgmr.msra.gmra.mrb[0].mxu1 %vm624_vm2, %v611_v14  ;;  %v852_v18 = vpop.permute.xlu0 %851 }
 0x243   : > { %v776_v19 = vpop.permute.xlu1 %775  ;;  %2048 = vmatpush3.xpose.msk.msra.mxu1 %vm624_vm2, %v852_v18  ;;  %2049 = vmatprep.mubr.msk.f32.mxu1 %vm2403_vm0, %v2404_v1 }
 0x244   : > { %2043 = vmatpush3.xpose.msk.msra.mxu0 %vm624_vm2, %v776_v19  ;;  %2057 = vmatprep.subr.mxu1 %v2404_v1 }
 0x245   : > { %2052 = vmatprep.subr.mxu0 %v2404_v1 }
 0x246   : > { %2050 = vmatmul.mubr.msk.f32.vlgmr.msra.gmra.mrb[2].mxu1 %vm624_vm2, %v2695_v13 }
 0x247   : > { %2045 = vmatmul.mubr.msk.f32.vlgmr.msra.gmra.mrb[4].mxu0 %vm624_vm2, %v2697_v16  ;;  %2059 = vmatprep.mubr.msk.f32.mxu1 %vm2403_vm0, %v2404_v1 }
 0x248   : > { %2054 = vmatprep.mubr.msk.f32.mxu0 %vm2403_vm0, %v2404_v1 }
 0x2a6   : > { %v695_v21 = vpop.f32.mrb[2].mxu0 }
 0x2a7   : > { %v696_v22 = vadd.f32 %v1948_v20, %v695_v21  ;;  %v2036_v23 = vpop.f32.mrb[3].mxu0 }
 0x2a9   : > { %v927_v24 = vsel %vm624_vm2, %v696_v22, -inf }
 0x2aa   : > { %928 = vmax.xlane.f32.xlu1 %v927_v24 }
 0x315   : > { %v771_v25 = vpop.f32.mrb[0].mxu1 }
 0x316   : > { %v772_v26 = vadd.f32 %v1948_v20, %v771_v25  ;;  %v2041_v27 = vpop.f32.mrb[1].mxu1 }
 0x318   : > { %v930_v28 = vsel %vm624_vm2, %v772_v26, -inf }
 0x319   : > { %931 = vmax.xlane.f32.xlu0 %v930_v28  ;;  %v923_v29 = vpop.f32.mrb[2].mxu1 }
 0x31a   : > { %v847_v30 = vpop.f32.mrb[4].mxu0  ;;  %v924_v31 = vadd.f32 %v1948_v20, %v923_v29  ;;  %v2051_v32 = vpop.f32.mrb[3].mxu1 }
 0x31b   : > { %v848_v33 = vadd.f32 %v1948_v20, %v847_v30  ;;  %v2046_v34 = vpop.f32.mrb[5].mxu0 }
 0x31c   : > { %v936_v35 = vsel %vm624_vm2, %v924_v31, -inf }
 0x31d   : > { %937 = vmax.xlane.f32.xlu1 %v936_v35  ;;  %v933_v36 = vsel %vm624_vm2, %v848_v33, -inf }
 0x31e   : > { %934 = vmax.xlane.f32.xlu0 %v933_v36 }
 0x32e   : > { %1047 = vrot.lane.b32.xlu1 %v611_v14, %s2409_s28  ;;  %v1277_v14 = vld [vmem:[%s2906_s4 + $0x10] sm:$0xff] }
 0x334   : > { %971 = vrot.lane.b32.xlu0 %v606_v11, %s2409_s28 }
 0x337   : > { %v929_v37 = vpop.xlane.xlu1 %928 }
 0x338   : > { %v939_v38 = vsub.f32 %v696_v22, %v929_v37 }
 0x33a   : > { %v943_v39 = vmul.f32 1.442695, %v939_v38 }
 0x33c   : > { %2221 = vpow2.f32 %v943_v39 }
 0x346   : > { %v2222_v40 = vpop.eup %2221 }
 0x347   : > { %v951_v41 = vsel %vm624_vm2, %v2222_v40, 0.0 }
 0x353   : > { %952 = vadd.xlane.f32.xlu0 %v951_v41 }
 0x3a6   : > { %v932_v42 = vpop.xlane.xlu0 %931 }
 0x3a7   : > { %v940_v43 = vsub.f32 %v772_v26, %v932_v42 }
 0x3a9   : > { %v945_v44 = vmul.f32 1.442695, %v940_v43 }
 0x3aa   : > { %v938_v45 = vpop.xlane.xlu1 %937 }
 0x3ab   : > { %2223 = vpow2.f32 %v945_v44  ;;  %v942_v46 = vsub.f32 %v924_v31, %v938_v45  ;;  %v935_v47 = vpop.xlane.xlu0 %934 }
 0x3ac   : > { %v941_v48 = vsub.f32 %v848_v33, %v935_v47  ;;  %v1617_v47 = vld [vmem:[%s2910_s8] sm:$0xff] }
 0x3ad   : > { %v949_v49 = vmul.f32 1.442695, %v942_v46 }
 0x3ae   : > { %v947_v50 = vmul.f32 1.442695, %v941_v48  ;;  %v1048_v51 = vpop.permute.xlu1 %1047  ;;  %v1618_v48 = vld [vmem:[%s2910_s8 + $0x8] sm:$0xff] }
 0x3af   : > { %2225 = vpow2.f32 %v949_v49  ;;  %v972_v52 = vpop.permute.xlu0 %971  ;;  %2058 = vmatpush3.msra.mxu1 %v1048_v51  ;;  %v2129_v49 = vpack.c.bf16 %v1618_v48, %v1617_v47 }
 0x3b0   : > { %2227 = vpow2.f32 %v947_v50  ;;  %2053 = vmatpush3.msra.mxu0 %v972_v52  ;;  %2067 = vmatprep.subr.mxu1 %v2404_v1  ;;  %v1620_v50 = vld [vmem:[%s2910_s8 + $0x18] sm:$0xff]  ;;  %v1702_v52 = vld [vmem:[%s2912_s10] sm:$0xff] }
 0x3b1   : > { %2062 = vmatprep.subr.mxu0 %v2404_v1 }
 0x3b5   : > { %v2224_v53 = vpop.eup %2223 }
 0x3b6   : > { %v954_v54 = vsel %vm624_vm2, %v2224_v53, 0.0 }
 0x3b7   : > { %955 = vadd.xlane.f32.xlu1 %v954_v54  ;;  %v1704_v54 = vld [vmem:[%s2912_s10 + $0x10] sm:$0xff] }
 0x3b9   : > { %v2226_v55 = vpop.eup %2225 }
 0x3ba   : > { %v2228_v56 = vpop.eup %2227  ;;  %v960_v57 = vsel %vm624_vm2, %v2226_v55, 0.0 }
 0x3bb   : > { %961 = vadd.xlane.f32.xlu1 %v960_v57  ;;  %v957_v58 = vsel %vm624_vm2, %v2228_v56, 0.0 }
 0x3bc   : > { %958 = vadd.xlane.f32.xlu0 %v957_v58  ;;  %v1706_v58 = vld [vmem:[%s2912_s10 + $0x20] sm:$0xff] }
 0x3cc   : > { %1123 = vrot.lane.b32.xlu1 %v2697_v16, %s2409_s28 }
 0x3d2   : > { %1199 = vrot.lane.b32.xlu0 %v2695_v13, %s2409_s28  ;;  %v1276_v13 = vld [vmem:[%s2906_s4 + $0x8] sm:$0xff]  ;;  %s2947_s28 = sld [smem:[#allocation18_spill]] }
 0x3e0   : > { %v953_v59 = vpop.xlane.xlu0 %952 }
 0x3e1   : > { %2229 = vrcp.f32 %v953_v59  ;;  %v1707_v59 = vld [vmem:[%s2912_s10 + $0x28] sm:$0xff] }
 0x3eb   : > { %v2230_v60 = vpop.eup %2229 }
 0x3ec   : > { %v967_v61 = vmul.f32 %v2230_v60, %v2222_v40  ;;  %v2141_v60 = vpack.c.bf16 %v1707_v59, %v1706_v58 }
 0x3ee   : > { %2055 = vmatmul.mubr.msk.f32.vlgmr.msra.gmra.mrb[6].mxu0 %vm624_vm2, %v967_v61 }
 0x3ef   : > { %2064 = vmatprep.mubr.msk.f32.mxu0 %vm2403_vm0, %v2404_v1 }
 0x444   : > { %v956_v62 = vpop.xlane.xlu1 %955 }
 0x445   : > { %2231 = vrcp.f32 %v956_v62 }
 0x448   : > { %v962_v63 = vpop.xlane.xlu1 %961 }
 0x449   : > { %2233 = vrcp.f32 %v962_v63  ;;  %v959_v2 = vpop.xlane.xlu0 %958 }
 0x44a   : > { %2235 = vrcp.f32 %v959_v2 }
 0x44c   : > { %v1124_v3 = vpop.permute.xlu1 %1123 }
 0x44d   : > { %2063 = vmatpush3.msra.mxu0 %v1124_v3  ;;  %v1200_v6 = vpop.permute.xlu0 %1199  ;;  %v1966_v3 = vld [vmem:[%s2908_s6] ss:$0 sm:$0xff] }
 0x44e   : > { %2072 = vmatprep.subr.mxu0 %v2404_v1 }
 0x44f   : > { %v2232_v4 = vpop.eup %2231 }
 0x450   : > { %v968_v5 = vmul.f32 %v2232_v4, %v2224_v53  ;;  %v1703_v53 = vld [vmem:[%s2912_s10 + $0x8] sm:$0xff] }
 0x452   : > { %2060 = vmatmul.mubr.msk.f32.vlgmr.msra.gmra.mrb[4].mxu1 %vm624_vm2, %v968_v5  ;;  %v1967_v5 = vld [vmem:[#allocation5] ss:$0 sm:$0xff] }
 0x453   : > { %v2234_v7 = vpop.eup %2233  ;;  %2068 = vmatpush3.msra.mxu1 %v1200_v6  ;;  %2069 = vmatprep.mubr.msk.f32.mxu1 %vm2403_vm0, %v2404_v1 }
 0x454   : > { %v2236_v9 = vpop.eup %2235  ;;  %v970_v10 = vmul.f32 %v2234_v7, %v2226_v55  ;;  %2077 = vmatprep.subr.mxu1 %v2404_v1  ;;  %v2135_v55 = vpack.c.bf16 %v1703_v53, %v1702_v52 }
 0x455   : > { %v969_v11 = vmul.f32 %v2236_v9, %v2228_v56  ;;  %v1705_v56 = vld [vmem:[%s2912_s10 + $0x18] sm:$0xff]  ;;  %v1708_v9 = vld [vmem:[%s2912_s10 + $0x30] sm:$0xff] }
 0x456   : > { %2070 = vmatmul.mubr.msk.f32.vlgmr.msra.gmra.mrb[6].mxu1 %vm624_vm2, %v970_v10  ;;  %v2138_v57 = vpack.c.bf16 %v1705_v56, %v1704_v54 }
 0x457   : > { %2065 = vmatmul.mubr.msk.f32.vlgmr.msra.gmra.mrb[8].mxu0 %vm624_vm2, %v969_v11  ;;  %2079 = vmatprep.mubr.msk.f32.mxu1 %vm2403_vm0, %v2404_v1  ;;  %v1968_v11 = vld [vmem:[#allocation7] ss:$0 sm:$0xff] }
 0x458   : > { %2073 = vmatpush3.msra.mxu0 %v1275_v12  ;;  %2074 = vmatprep.mubr.msk.f32.mxu0 %vm2403_vm0, %v2404_v1 }
 0x459   : > { %2082 = vmatprep.subr.mxu0 %v2404_v1  ;;  %2078 = vmatpush3.msra.mxu1 %v1276_v13 }
 0x45a   : > { %2087 = vmatprep.subr.mxu1 %v2404_v1 }
 0x4c1   : > { %v1043_v15 = vpop.f32.mrb[6].mxu0 }
 0x4c2   : > { %v2056_v16 = vpop.f32.mrb[7].mxu0  ;;  %2075 = vmatmul.mubr.msk.f32.vlgmr.msra.gmra.mrb[10].mxu0 %vm624_vm2, %v1043_v15 }
 0x4c3   : > { %2083 = vmatpush3.msra.mxu0 %v1277_v14  ;;  %2084 = vmatprep.mubr.msk.f32.mxu0 %vm2403_vm0, %v2404_v1  ;;  %v1970_v16 = vld [vmem:[%s2913_s11] ss:$0 sm:$0xff] }
 0x4c4   : > { %2128 = vmatprep.subr.bf16.mxu0 %v2402_v0 }
 0x525   : > { %v1119_v18 = vpop.f32.mrb[4].mxu1 }
 0x526   : > { %v2061_v19 = vpop.f32.mrb[5].mxu1  ;;  %2080 = vmatmul.mubr.msk.f32.vlgmr.msra.gmra.mrb[8].mxu1 %vm624_vm2, %v1119_v18 }
 0x527   : > { %2088 = vmatpush3.msra.mxu1 %v1278_v17  ;;  %2089 = vmatprep.mubr.msk.f32.mxu1 %vm2403_vm0, %v2404_v1 }
 0x528   : > { %2134 = vmatprep.subr.bf16.mxu1 %v2402_v0 }
 0x529   : > { %v1271_v20 = vpop.f32.mrb[6].mxu1 }
 0x52a   : > { %v1195_v21 = vpop.f32.mrb[8].mxu0  ;;  %v2071_v22 = vpop.f32.mrb[7].mxu1  ;;  %2090 = vmatmul.mubr.msk.f32.vlgmr.msra.gmra.mrb[10].mxu1 %vm624_vm2, %v1271_v20 }
 0x52b   : > { %v2066_v23 = vpop.f32.mrb[9].mxu0  ;;  %2085 = vmatmul.mubr.msk.f32.vlgmr.msra.gmra.mrb[12].mxu0 %vm624_vm2, %v1195_v21  ;;  %2119 = vmatprep.mubr.msk.f32.mxu1 %vm2403_vm0, %v2404_v1 }
 0x52c   : > { %2100 = vmatprep.mubr.msk.f32.mxu0 %vm2403_vm0, %v2404_v1  ;;  %v1965_v1 = vld [vmem:[%s2907_s5] ss:$0 sm:$0xff]  ;;  %2130 = vmatpush3.bf16.msra.mxu0 %v2129_v49 }
 0x52d   : > { %2131 = vmatprep.subr.bf16.mxu0 %v2402_v0  ;;  %2136 = vmatpush3.bf16.msra.mxu1 %v2135_v55 }
 0x52e   : > { %2137 = vmatprep.subr.bf16.mxu1 %v2402_v0 }
 0x531   : > { %2139 = vmatpush3.bf16.msra.mxu1 %v2138_v57 }
 0x532   : > { %2140 = vmatprep.subr.bf16.mxu1 %v2402_v0 }
 0x535   : > { %2142 = vmatpush3.bf16.msra.mxu1 %v2141_v60 }
 0x536   : > { %2143 = vmatprep.subr.bf16.mxu1 %v2402_v0  ;;  %v1709_v0 = vld [vmem:[%s2912_s10 + $0x38] sm:$0xff] }
 0x537   : > { %v2144_v10 = vpack.c.bf16 %v1709_v0, %v1708_v9 }
 0x539   : > { %2145 = vmatpush3.bf16.msra.mxu1 %v2144_v10 }
 0x595   : > { %v1348_v24 = vpop.f32.mrb[10].mxu0 }
 0x596   : > { %v2076_v25 = vpop.f32.mrb[11].mxu0  ;;  %v1571_v27 = vsel %vm535_vm1, %v1348_v24, 0.0 }
 0x5f9   : > { %v1421_v26 = vpop.f32.mrb[8].mxu1 }
 0x5fa   : > { %v1572_v28 = vsel %vm535_vm1, %v1421_v26, 0.0  ;;  %v2081_v29 = vpop.f32.mrb[9].mxu1 }
 0x5fb   : > { %v1573_v30 = vadd.f32 %v1572_v28, %v1571_v27 }
 0x5fd   : > { %v1567_v31 = vpop.f32.mrb[10].mxu1 }
 0x5fe   : > { %v1494_v32 = vpop.f32.mrb[12].mxu0  ;;  %v2091_v33 = vpop.f32.mrb[11].mxu1  ;;  %v1576_v37 = vsel %vm535_vm1, %v1567_v31, 0.0  ;;  %v1972_v31 = vld [vmem:[%s2946_s20] ss:$0 sm:$0xff]  ;;  %s2333_s20 = scalar_lea.vmem %s2332_s23, 256 }
 0x5ff   : > { %v1574_v34 = vsel %vm535_vm1, %v1494_v32, 0.0  ;;  %v2086_v35 = vpop.f32.mrb[13].mxu0  ;;  %v1973_v33 = vld [vmem:[%s2947_s28] ss:$0 sm:$0xff]  ;;  %p2335_p3 = scmp.lt.s32.totalorder %s2333_s20, %s2327_s13 }
 0x600   : > { %v1575_v36 = vadd.f32 %v1574_v34, %v1573_v30 }
 0x601   : > { %p2336_p7 = por %p2335_p3, %p2334_p12 }
 0x602   : > { %v1577_v38 = vadd.f32 %v1576_v37, %v1575_v36 }
 0x603   : > { %p2337_p10 = pnand %p2336_p7, %p2330_p8 }
 0x604   : > { %v1585_v39 = vadd.f32 %v1965_v1, %v1577_v38 }
 0x606   : > { %v1586_v40 = vadd.f32 %v1585_v39, %v2685_v8  ;;  %v1619_v8 = vld [vmem:[%s2910_s8 + $0x10] sm:$0xff] }
 0x607   : > { %v2132_v51 = vpack.c.bf16 %v1620_v50, %v1619_v8 }
 0x608   : > { %v1589_v41 = vsel %vm535_vm1, %v1586_v40, 0.0 }
 0x609   : > { %1590 = vadd.xlane.f32.xlu1 %v1589_v41  ;;  %2133 = vmatpush3.bf16.msra.mxu0 %v2132_v51 }
 0x696   : > { %v1591_v42 = vpop.xlane.xlu1 %1590 }
 0x697   : > { %v1593_v43 = vmul.f32 0.03125, %v1591_v42 }
 0x699   : > { %v1594_v44 = vsub.f32 %v1586_v40, %v1593_v43 }
 0x69b   : > { %v1595_v45 = vmul.f32 %v1594_v44, %v1594_v44 }
 0x69d   : > { %v1596_v46 = vsel %vm535_vm1, %v1595_v45, 0.0 }
 0x69e   : > { %1597 = vadd.xlane.f32.xlu0 %v1596_v46 }
 0x72b   : > { %v1598_v61 = vpop.xlane.xlu0 %1597 }
 0x72c   : > { %v1599_v62 = vmul.f32 0.03125, %v1598_v61 }
 0x72e   : > { %v1600_v63 = vadd.f32 1e-12, %v1599_v62 }
 0x730   : > { %2237 = vrsqrt.f32 %v1600_v63 }
 0x73a   : > { %v2238_v2 = vpop.eup %2237 }
 0x73b   : > { %v1602_v4 = vmul.f32 %v2238_v2, %v1594_v44 }
 0x73d   : > { %v1609_v6 = vmul.f32 %v1966_v3, %v1602_v4 }
 0x73f   : > { %v1616_v7 = vadd.f32 %v1967_v5, %v1609_v6 }
 0x741   : > { %2101 = vmatmul.mubr.msk.f32.vlgmr.msra.gmra.mrb[14].mxu0 %vm535_vm1, %v1616_v7 }
 0x814   : > { %v1697_v12 = vpop.f32.mrb[14].mxu0 }
 0x815   : > { %v1698_v13 = vadd.f32 %v1968_v11, %v1697_v12  ;;  %v2102_v14 = vpop.f32.mrb[15].mxu0 }
 0x817   : > { %v1701_v15 = vmax.f32 %v1698_v13, 0.0 }
 0x819   : > { %2120 = vmatmul.mubr.msk.f32.vlgmr.msra.gmra.mrb[12].mxu1 %vm1717_vm3, %v1701_v15 }
 0x8ec   : > { %v1787_v17 = vpop.f32.mrb[12].mxu1 }
 0x8ed   : > { %v1788_v18 = vadd.f32 %v1970_v16, %v1787_v17  ;;  %v2121_v19 = vpop.f32.mrb[13].mxu1 }
 0x8ef   : > { %v1791_v20 = vadd.f32 %v1788_v18, %v1616_v7 }
 0x8f1   : > { %v1794_v21 = vsel %vm535_vm1, %v1791_v20, 0.0 }
 0x8f2   : > { %1795 = vadd.xlane.f32.xlu0 %v1794_v21 }
 0x97f   : > { %v1796_v22 = vpop.xlane.xlu0 %1795 }
 0x980   : > { %v1797_v23 = vmul.f32 0.03125, %v1796_v22 }
 0x982   : > { %v1798_v24 = vsub.f32 %v1791_v20, %v1797_v23 }
 0x984   : > { %v1799_v25 = vmul.f32 %v1798_v24, %v1798_v24 }
 0x986   : > { %v1800_v26 = vsel %vm535_vm1, %v1799_v25, 0.0 }
 0x987   : > { %1801 = vadd.xlane.f32.xlu1 %v1800_v26 }
 0xa14   : > { %v1802_v27 = vpop.xlane.xlu1 %1801 }
 0xa15   : > { %v1803_v28 = vmul.f32 0.03125, %v1802_v27 }
 0xa17   : > { %v1804_v29 = vadd.f32 1e-12, %v1803_v28 }
 0xa19   : > { %2239 = vrsqrt.f32 %v1804_v29 }
 0xa23   : > { %v2240_v30 = vpop.eup %2239 }
 0xa24   : > { %v1806_v32 = vmul.f32 %v2240_v30, %v1798_v24 }
 0xa26   : > { %v1813_v34 = vmul.f32 %v1972_v31, %v1806_v32 }
 0xa28   : > { %v1820_v35 = vadd.f32 %v1973_v33, %v1813_v34 }
 0xa2a   : > { %1821 = vst.msk [vmem:[%s518_s29] sm:$0xff] %vm535_vm1, %v1820_v35 }
 0xa2b   : > { %2340 = shalt.err (!%p2337_p10)
}
 0xa2c   : > { %s2341_s7 = scalar_lea.hbm %s2857_s1, 128  ;;  %s2345_s28 = scalar_lea.hbm %s2948_s0, 256 }
 0xa2d   : > { %p2342_p13 = scmp.ne.s32.totalorder %s2857_s1, %s2341_s7  ;;  %p2346_p11 = scmp.lt.u32.totalorder %s2857_s1, %s2948_s0 }
 0xa2e   : > { %p2347_p9 = scmp.lt.u32.totalorder %s2345_s28, %s2341_s7  ;;  %p2349_p1 = scmp.lt.u32.totalorder %s2341_s7, %s2857_s1 }
 0xa2f   : > { %p2343_p5 = pnand %p2342_p13, %p2606_p6 }
 0xa30   : > { %p2348_p2 = por %p2347_p9, %p2346_p11 }
 0xa31   : > { %p2344_p0 = pneg %p2343_p5 }
 0xa32   : > { %p2350_p4 = por %p2349_p1, %p2348_p2 }
 0xa34   : > { %p2351_p8 = pnand %p2350_p4, %p2344_p0 }
 0xa36   : > { %2354 = shalt.err (!%p2351_p8)
}
 0xa37   : > { %2156 = dma.vmem_to_hbm [thread:$0]  (%p2606_p6), %s2859_s19, 128, %s2857_s1, %s1823_s25  }
 0xa38 PF: > { %s2949_s24 = sld [smem:[#allocation12_spill]]  ;;  %s2950_s21 = sld [smem:[#allocation13_spill]] }
 0xa39   : > { %p2952_p3 = scmp.ge.s32.totalorder %s2397_s16, 2 }
 0xa3e   : > { %s1848_s13 = sand.u32 1, %s2949_s24   ;;  %p2951_p12 = scmp.ne.s32.totalorder %s2950_s21, 0 }
 0xa3f   : > { %s1849_s17 = scalar_lea.sflag [#allocation4], %s1848_s13 }
 0xa40   : > { %p2170_p7 = pnand %p2952_p3, %p2951_p12 }
 0xa42   : > { %2380 = dma.done.wait (!%p2170_p7), %s1849_s17, 128  }
 0xa43   : > { %2382 = vsyncadd (!%p2170_p7), %s1849_s17, 4294967168  ;;  %p28_p10 = scmp.ge.s32.totalorder %s2542_s27, 4   ;;  %s2953_s29 = smov %s2389_s30 }
 0xa44   : > { %s2954_s30 = smov %s2393_s15  ;;  %s2955_s15 = smov %s2602_s26 }
 0xa45   : > { %s2956_s16 = smov %s2542_s27  ;;  %30 = sbr.rel (!%p28_p10) target bundleno = 13 (0xd), region = 132 }
 0xa4c   :  { %1854 = vsyncpa [#allocation3], 1 }
 0xa4d   :  { %1856 = vsyncpa [#allocation3 + $0x1], 1 }
 0xa4e   :  { %1857 = vsyncpa [#allocation6], 1 }
 0xa4f   :  { %1858 = vsyncpa [#allocation4], 1 }
 0xa50   :  { %1860 = vsyncpa [#allocation4 + $0x1], 1 }

</bundles_post_ra>
